<compile_context>
chip_gen: v6e
topology: v6e:2x2x1
jax: 0.10.0
libtpu: 0.0.40
codegen_flags: <defaults>
</compile_context>

<pallas_src>
import functools

import jax
import jax.numpy as jnp
from jax.experimental import pallas as pl
from jax.experimental.pallas import tpu as pltpu


# ------------------------------- Pallas kernel ------------------------------
def _layernorm2d_kernel(x_ref, w_ref, b_ref, o_ref, *, eps):
    # x_ref block: (1, C, T)  -- C on sublanes, T (spatial tile) on lanes.
    x = x_ref[0].astype(jnp.float32)                   # (C, T)
    mu = jnp.mean(x, axis=0, keepdims=True)            # (1, T) sublane reduce
    xc = x - mu
    var = jnp.mean(xc * xc, axis=0, keepdims=True)     # biased variance (matches ref)
    inv = jax.lax.rsqrt(var + eps)                     # EUP rsqrt, not a VALU divide
    y = xc * inv                                       # (C, T)
    # w_ref / b_ref are (C, 1): per-channel affine, broadcast over lanes.
    o_ref[0] = (w_ref[...] * y + b_ref[...]).astype(o_ref.dtype)


# ------------------------------- tile selection ------------------------------
def _spatial_tile(hw, c, elem_bytes=4):
    """Largest lane-dense spatial tile that fits a conservative VMEM budget."""
    if hw % 128 != 0:
        # Full-extent lane block (still valid: block dim == full array dim).
        # TODO(synk): pad HW up to a multiple of 128 for lane-dense stores here.
        return hw
    # x (2 buffers) + out (2 buffers) in f32, with headroom -> ~6x per element.
    budget_bytes = 12 * 1024 * 1024          # fits v5e's 16 MiB default scoped VMEM
    max_tile = budget_bytes // (6 * max(c, 1) * elem_bytes)
    max_tile = max(128, (max_tile // 128) * 128)
    return min(hw, max_tile, 8192)


# --------------------------------- wrapper -----------------------------------
def layernorm2d(x, weight, bias, eps=1e-6):
    """LayerNorm2d forward: normalize over C per (n, h, w), then scale + shift.

    x: (N, C, H, W);  weight, bias: (C,).  Returns (N, C, H, W), same dtype as x.
    """
    n, c, h, w = x.shape
    hw = h * w
    x2 = x.reshape(n, c, hw)                 # free reshape in NCHW, no transpose
    tile = _spatial_tile(hw, c)
    grid = (n, pl.cdiv(hw, tile))

    out = pl.pallas_call(
        functools.partial(_layernorm2d_kernel, eps=eps),
        out_shape=jax.ShapeDtypeStruct((n, c, hw), x.dtype),
        grid=grid,
        in_specs=[
            pl.BlockSpec((1, c, tile), lambda i, j: (i, 0, j)),
            pl.BlockSpec((c, 1), lambda i, j: (0, 0)),
            pl.BlockSpec((c, 1), lambda i, j: (0, 0)),
        ],
        out_specs=pl.BlockSpec((1, c, tile), lambda i, j: (i, 0, j)),
        compiler_params=pltpu.CompilerParams(
            dimension_semantics=("parallel", "parallel")),
    )(x2, weight.reshape(c, 1), bias.reshape(c, 1))

    return out.reshape(n, c, h, w)


# -------------------------------- reference ----------------------------------
def _reference(x, weight, bias, eps=1e-6):
    mu = jnp.mean(x, axis=1, keepdims=True)
    var = jnp.mean((x - mu) ** 2, axis=1, keepdims=True)
    y = (x - mu) / jnp.sqrt(var + eps)
    return weight[None, :, None, None] * y + bias[None, :, None, None]


# ----------------------------------- main -------------------------------------
if __name__ == "__main__":
    key = jax.random.PRNGKey(0)
    kx, kw, kb, kx2 = jax.random.split(key, 4)

    # Primary test: small shapes consistent with the module (N=2, C=4, 16x16).
    x = jax.random.normal(kx, (2, 4, 16, 16), jnp.float32)
    w = jax.random.normal(kw, (4,), jnp.float32)
    b = jax.random.normal(kb, (4,), jnp.float32)

    fwd = jax.jit(layernorm2d)
    out = fwd(x, w, b)
    jax.block_until_ready(out)

    ref = _reference(x, w, b)
    assert out.shape == x.shape, out.shape
    assert bool(jnp.isfinite(out).all())
    assert bool(jnp.allclose(out, ref, atol=1e-5, rtol=1e-5)), \
        float(jnp.max(jnp.abs(out - ref)))

    # Secondary test: spatial extent not a multiple of 128 (full-extent lane block)
    # and a larger channel count, to exercise the fallback tile path.
    x2 = jax.random.normal(kx2, (1, 32, 10, 10), jnp.float32)
    w2 = jnp.linspace(0.5, 1.5, 32, dtype=jnp.float32)
    b2 = jnp.linspace(-0.1, 0.1, 32, dtype=jnp.float32)
    out2 = jax.jit(layernorm2d)(x2, w2, b2)
    jax.block_until_ready(out2)
    assert bool(jnp.allclose(out2, _reference(x2, w2, b2), atol=1e-5, rtol=1e-5))

    print("KERNEL_OK")
</pallas_src>

<mosaic_0001>
module attributes {stable_mosaic.version = 11 : i64} {
  func.func @_layernorm2d_kernel(%arg0: i32, %arg1: i32, %arg2: memref<1x4x256xf32, #tpu.memory_space<vmem>>, %arg3: memref<4x1xf32, #tpu.memory_space<vmem>>, %arg4: memref<4x1xf32, #tpu.memory_space<vmem>>, %arg5: memref<1x4x256xf32, #tpu.memory_space<vmem>>) attributes {dimension_semantics = [#tpu.dimension_semantics<parallel>, #tpu.dimension_semantics<parallel>], iteration_bounds = array<i64: 2, 1>, scalar_prefetch = 0 : i64, scratch_operands = 0 : i64, tpu.core_type = #tpu.core_type<tc>, window_params = [{transform_indices = @transform_0, window_bounds = array<i64: 1, 4, 256>}, {pipeline_mode = #tpu.pipeline_mode<synchronous>, transform_indices = @transform_1, window_bounds = array<i64: 4, 1>}, {pipeline_mode = #tpu.pipeline_mode<synchronous>, transform_indices = @transform_2, window_bounds = array<i64: 4, 1>}, {transform_indices = @transform_3, window_bounds = array<i64: 1, 4, 256>}]} {
    %c0 = arith.constant 0 : index
    %c0_0 = arith.constant 0 : index
    %c0_1 = arith.constant 0 : index
    %0 = vector.load %arg2[%c0, %c0_0, %c0_1] : memref<1x4x256xf32, #tpu.memory_space<vmem>>, vector<1x4x256xf32>
    %1 = vector.shape_cast %0 : vector<1x4x256xf32> to vector<4x256xf32>
    %cst = arith.constant dense<0.000000e+00> : vector<256xf32>
    %2 = vector.multi_reduction <add>, %1, %cst [0] : vector<4x256xf32> to vector<256xf32>
    %3 = vector.shape_cast %2 : vector<256xf32> to vector<1x256xf32>
    %cst_2 = arith.constant 4.000000e+00 : f32
    %4 = vector.broadcast %cst_2 : f32 to vector<1x256xf32>
    %5 = arith.divf %3, %4 : vector<1x256xf32>
    %6 = vector.broadcast %5 : vector<1x256xf32> to vector<4x256xf32>
    %7 = arith.subf %1, %6 : vector<4x256xf32>
    %8 = arith.mulf %7, %7 : vector<4x256xf32>
    %cst_3 = arith.constant dense<0.000000e+00> : vector<256xf32>
    %9 = vector.multi_reduction <add>, %8, %cst_3 [0] : vector<4x256xf32> to vector<256xf32>
    %10 = vector.shape_cast %9 : vector<256xf32> to vector<1x256xf32>
    %cst_4 = arith.constant 4.000000e+00 : f32
    %11 = vector.broadcast %cst_4 : f32 to vector<1x256xf32>
    %12 = arith.divf %10, %11 : vector<1x256xf32>
    %cst_5 = arith.constant 9.99999997E-7 : f32
    %13 = vector.broadcast %cst_5 : f32 to vector<1x256xf32>
    %14 = arith.addf %12, %13 : vector<1x256xf32>
    %15 = math.rsqrt %14 : vector<1x256xf32>
    %16 = vector.broadcast %15 : vector<1x256xf32> to vector<4x256xf32>
    %17 = arith.mulf %7, %16 : vector<4x256xf32>
    %c0_6 = arith.constant 0 : index
    %c0_7 = arith.constant 0 : index
    %18 = vector.load %arg3[%c0_6, %c0_7] : memref<4x1xf32, #tpu.memory_space<vmem>>, vector<4x1xf32>
    %19 = vector.broadcast %18 : vector<4x1xf32> to vector<4x256xf32>
    %20 = arith.mulf %19, %17 : vector<4x256xf32>
    %c0_8 = arith.constant 0 : index
    %c0_9 = arith.constant 0 : index
    %21 = vector.load %arg4[%c0_8, %c0_9] : memref<4x1xf32, #tpu.memory_space<vmem>>, vector<4x1xf32>
    %22 = vector.broadcast %21 : vector<4x1xf32> to vector<4x256xf32>
    %23 = arith.addf %20, %22 : vector<4x256xf32>
    %c0_10 = arith.constant 0 : index
    %c0_11 = arith.constant 0 : index
    %c0_12 = arith.constant 0 : index
    %24 = vector.load %arg5[%c0_10, %c0_11, %c0_12] : memref<1x4x256xf32, #tpu.memory_space<vmem>>, vector<1x4x256xf32>
    %25 = vector.shape_cast %24 : vector<1x4x256xf32> to vector<4x256xf32>
    %26 = vector.shape_cast %23 : vector<4x256xf32> to vector<1x4x256xf32>
    tpu.vector_store %arg5[%c0_10, %c0_11, %c0_12], %26 {strides = array<i32>} : memref<1x4x256xf32, #tpu.memory_space<vmem>>, vector<1x4x256xf32>,
    return
  }
  func.func @transform_0(%arg0: i32, %arg1: i32) -> (i32, i32, i32) {
    %c0_i32 = arith.constant 0 : i32
    %c0_i32_0 = arith.constant 0 : i32
    return %arg0, %c0_i32, %arg1 : i32, i32, i32
  }
  func.func @transform_1(%arg0: i32, %arg1: i32) -> (i32, i32) {
    %c0_i32 = arith.constant 0 : i32
    %c0_i32_0 = arith.constant 0 : i32
    %c0_i32_1 = arith.constant 0 : i32
    return %c0_i32, %c0_i32_0 : i32, i32
  }
  func.func @transform_2(%arg0: i32, %arg1: i32) -> (i32, i32) {
    %c0_i32 = arith.constant 0 : i32
    %c0_i32_0 = arith.constant 0 : i32
    %c0_i32_1 = arith.constant 0 : i32
    return %c0_i32, %c0_i32_0 : i32, i32
  }
  func.func @transform_3(%arg0: i32, %arg1: i32) -> (i32, i32, i32) {
    %c0_i32 = arith.constant 0 : i32
    %c0_i32_0 = arith.constant 0 : i32
    return %arg0, %c0_i32, %arg1 : i32, i32, i32
  }
}

</mosaic_0001>

<bundles_post_ra>
// kernel: layernorm2d.1
= control target key start
LH: loop header
LB: loop body
LE: loop exit
PB: predicated region body
PF: predicated region fallthrough
CT: control target
= control target key end

     0   :  { %s466_s12 = smov 0   ;;  %s468_s13 = smov 0   ;;  %s516_s0 = inlined_call_operand.vmem [shape: f32[2,4,256], index: 0, kind: input, shape index: {}]   ;;  %s517_s1 = inlined_call_operand.vmem [shape: f32[4,1], index: 1, kind: input, shape index: {}]   ;;  %s518_s2 = inlined_call_operand.vmem [shape: f32[4,1], index: 2, kind: input, shape index: {}]   ;;  %s519_s3 = inlined_call_operand.vmem [shape: f32[2,4,256], index: 3, kind: output, shape index: {}]  }
   0x1   :  { %s470_s14 = smov 0  }
   0x2 LB: > { %s25_s15 = sadd.s32 1, %s439_s13  ;;  %p381_p0 = scmp.ge.s32.totalorder %s443_s14, 1  ;;  %s443_s14 = sphi %s470_s14, %s13_s14   ;;  %s439_s13 = sphi %s468_s13, %s521_s13   ;;  %s435_s12 = sphi %s466_s12, %s520_s12  }
   0x3   : > { %p27_p1 = scmp.ge.s32.totalorder %s25_s15, 2  ;;  %p158_p2 = scmp.lt.s32.totalorder %s443_s14, 3 }
   0x5   : > { %s523_s15 = smov (%p27_p1, %s25_s15), 0  ;;  %p159_p3 = pnand %p381_p0, %p158_p2 }
   0x6   : > { %p191_p4 = scmp.lt.s32.totalorder (!%p159_p3), %s435_s12, 1 }
   0x7   : > { %162 = sbr.rel (%p159_p3) target bundleno = 147 (0x93), region = 32 }
   0xc   : > { %v266_v0 = vld [vmem:[%s517_s1] sm:$0xf]  ;;  %v445_v1 = vmov 0   ;;  %s525_s12 = smov (!%p191_p4, %s435_s12), 1  ;;  %vm214_vm0 = vcmask 1043456  }
   0xd   : > { %415 = vset.pattern.permute.xlu0 %v445_v1  ;;  %v277_v2 = vld [vmem:[%s518_s2] sm:$0xf]  ;;  %s388_s20 = sshll.u32 %s525_s12, 3 }
   0xe   : > { %269 = vperm.xlu0 %415, %v266_v0   ;;  %s198_s23 = scalar_lea.vmem %s516_s0, %s388_s20  ;;  %s208_s26 = scalar_lea.vmem %s519_s3, %s388_s20 }
   0xf   : > { %v210_v3 = vld [vmem:[%s198_s23] sm:$0xff] }
  0x10   : > { %v212_v4 = vcombine.high %v210_v3, %v210_v3  ;;  %v215_v5 = vsel %vm214_vm0, %v210_v3, 0.0 }
  0x11   : > { %v216_v7 = vrot.slane %v215_v5, 4 }
  0x12   : > { %280 = vperm.xlu0 %415, %v277_v2   ;;  %v222_v6 = vsel %vm214_vm0, %v212_v4, 0.0 }
  0x13   : > { %v223_v8 = vrot.slane %v222_v6, 4  ;;  %v217_v9 = vadd.f32 %v216_v7, %v215_v5 }
  0x15   : > { %v224_v10 = vadd.f32 %v223_v8, %v222_v6  ;;  %v218_v11 = vrot.slane %v217_v9, 2 }
  0x17   : > { %v225_v12 = vrot.slane %v224_v10, 2  ;;  %v219_v13 = vadd.f32 %v218_v11, %v217_v9 }
  0x19   : > { %v226_v14 = vadd.f32 %v225_v12, %v224_v10  ;;  %v220_v15 = vrot.slane %v219_v13, 1 }
  0x1b   : > { %v227_v16 = vrot.slane %v226_v14, 1  ;;  %v221_v17 = vadd.f32 %v220_v15, %v219_v13 }
  0x1d   : > { %v228_v18 = vadd.f32 %v227_v16, %v226_v14  ;;  %v230_v19 = vmul.f32 0.25, %v221_v17 }
  0x1f   : > { %v231_v20 = vmul.f32 0.25, %v228_v18 }
  0x21   : > { %v234_v21 = vcombine.low %v230_v19, %v231_v20 }
  0x23   : > { %v236_v22 = vsub.f32 %v210_v3, %v234_v21 }
  0x25   : > { %v237_v23 = vmul.f32 %v236_v22, %v236_v22 }
  0x27   : > { %v239_v24 = vcombine.high %v237_v23, %v237_v23  ;;  %v241_v25 = vsel %vm214_vm0, %v237_v23, 0.0 }
  0x28   : > { %v242_v27 = vrot.slane %v241_v25, 4 }
  0x29   : > { %v248_v26 = vsel %vm214_vm0, %v239_v24, 0.0 }
  0x2a   : > { %v249_v28 = vrot.slane %v248_v26, 4  ;;  %v243_v29 = vadd.f32 %v242_v27, %v241_v25 }
  0x2c   : > { %v250_v30 = vadd.f32 %v249_v28, %v248_v26  ;;  %v244_v31 = vrot.slane %v243_v29, 2 }
  0x2e   : > { %v251_v32 = vrot.slane %v250_v30, 2  ;;  %v245_v33 = vadd.f32 %v244_v31, %v243_v29 }
  0x30   : > { %v252_v34 = vadd.f32 %v251_v32, %v250_v30  ;;  %v246_v35 = vrot.slane %v245_v33, 1 }
  0x32   : > { %v253_v36 = vrot.slane %v252_v34, 1  ;;  %v247_v37 = vadd.f32 %v246_v35, %v245_v33 }
  0x34   : > { %v254_v38 = vadd.f32 %v253_v36, %v252_v34  ;;  %v255_v39 = vmul.f32 0.25, %v247_v37 }
  0x36   : > { %v256_v40 = vmul.f32 0.25, %v254_v38  ;;  %v257_v41 = vadd.f32 1e-06, %v255_v39 }
  0x38   : > { %v258_v42 = vadd.f32 1e-06, %v256_v40  ;;  %417 = vrsqrt.f32 %v257_v41 }
  0x3a   : > { %419 = vrsqrt.f32 %v258_v42 }
  0x45   : > { %v418_v43 = vpop.eup %417 }
  0x47   : > { %v420_v44 = vpop.eup %419 }
  0x48   : > { %v263_v45 = vcombine.low %v418_v43, %v420_v44 }
  0x4a   : > { %v265_v46 = vmul.f32 %v263_v45, %v236_v22 }
  0x4c   : > { %v273_v47 = vcombine.high %v265_v46, %v265_v46 }
  0x89   : > { %v270_v48 = vpop.permute.xlu0 %269 }
  0x8a   : > { %v275_v49 = vmul.f32 %v270_v48, %v265_v46  ;;  %v276_v50 = vmul.f32 %v273_v47, %v270_v48 }
  0x8d   : > { %v281_v51 = vpop.permute.xlu0 %280 }
  0x8e   : > { %v283_v52 = vadd.f32 %v281_v51, %v275_v49  ;;  %v284_v53 = vadd.f32 %v281_v51, %v276_v50 }
  0x90   : > { %v287_v54 = vcombine.low %v283_v52, %v284_v53 }
  0x92   : > { %289 = vst [vmem:[%s208_s26] sm:$0xff] %v287_v54 }
  0x93 PF: > { %s13_s14 = sadd.s32 1, %s443_s14   ;;  %s520_s12 = smov %s439_s13 }
  0x94   : > { %p10_p5 = scmp.ge.s32.totalorder %s13_s14, 4   ;;  %s521_s13 = smov %s523_s15 }
  0x96   :  { %12 = sbr.rel (!%p10_p5) target bundleno = 2 (0x2), region = 62 }

</bundles_post_ra>
